<compile_context>
chip_gen: v7x
topology: tpu7x:2x2x1
jax: 0.10.0
libtpu: 0.0.40
codegen_flags: <defaults>
</compile_context>

<pallas_src>
import functools

import jax
import jax.numpy as jnp
import numpy as np
from jax import lax
from jax.experimental import pallas as pl
from jax.experimental.pallas import tpu as pltpu


def _attention_kernel(x_ref, wqkv_ref, wo_ref, bo_ref, o_ref, acc_ref, *,
                      heads, dim_head, scale):
    inner = heads * dim_head
    x = x_ref[0]                                                   # (N, D) f32

    # Fused QKV projection: one lane-dense (N, D) @ (D, 3*H*dh) MXU pass.
    qkv = jnp.dot(x, wqkv_ref[...],
                  preferred_element_type=jnp.float32)              # (N, 3*inner)

    # Per-head attention (unrolled static loop; H=8, tiny tiles).
    for h in range(heads):
        q_h = qkv[:, h * dim_head:(h + 1) * dim_head]              # (N, dh)
        k_h = qkv[:, inner + h * dim_head: inner + (h + 1) * dim_head]
        v_h = qkv[:, 2 * inner + h * dim_head: 2 * inner + (h + 1) * dim_head]

        # q @ k^T without materializing a transpose: contract dim 1 of both.
        dots = lax.dot_general(
            q_h, k_h, (((1,), (1,)), ((), ())),
            preferred_element_type=jnp.float32) * scale            # (N, N)

        # Numerically-stable softmax; denom reciprocal goes to the EUP slot.
        m = jnp.max(dots, axis=-1, keepdims=True)
        p = jnp.exp(dots - m)
        s = jnp.sum(p, axis=-1, keepdims=True)
        attn = p * pl.reciprocal(s, approx=True)

        # Assemble 'b n (h d)' head-concatenated output in VMEM scratch.
        acc_ref[:, h * dim_head:(h + 1) * dim_head] = jnp.dot(
            attn, v_h, preferred_element_type=jnp.float32)         # (N, dh)

    # Single fused output projection over all heads + bias, one output store.
    y = jnp.dot(acc_ref[...], wo_ref[...],
                preferred_element_type=jnp.float32) + bo_ref[...]  # (N, D)
    o_ref[0] = y.astype(o_ref.dtype)


def attention_pallas(x, w_qkv, w_out, b_out, *, heads, dim_head, scale):
    """x: (B, N, D); w_qkv: (D, 3*H*dh); w_out: (H*dh, D); b_out: (1, D)."""
    B, N, D = x.shape
    inner = heads * dim_head
    assert w_qkv.shape == (D, 3 * inner)
    assert w_out.shape == (inner, D)
    assert b_out.shape == (1, D)

    kernel = functools.partial(_attention_kernel, heads=heads,
                               dim_head=dim_head, scale=scale)

    return pl.pallas_call(
        kernel,
        out_shape=jax.ShapeDtypeStruct((B, N, D), jnp.float32),
        grid_spec=pltpu.PrefetchScalarGridSpec(
            num_scalar_prefetch=0,
            grid=(B,),
            in_specs=[
                pl.BlockSpec((1, N, D), lambda b: (b, 0, 0)),      # x (per batch)
                pl.BlockSpec((D, 3 * inner), lambda b: (0, 0)),    # fused Wqkv
                pl.BlockSpec((inner, D), lambda b: (0, 0)),        # Wo (all heads)
                pl.BlockSpec((1, D), lambda b: (0, 0)),            # bias
            ],
            out_specs=pl.BlockSpec((1, N, D), lambda b: (b, 0, 0)),
            scratch_shapes=[pltpu.VMEM((N, inner), jnp.float32)],  # head-concat acc
        ),
        compiler_params=pltpu.CompilerParams(
            dimension_semantics=("parallel",)),
    )(x, w_qkv, w_out, b_out)


def attention_reference(x, w_qkv, w_out, b_out, *, heads, dim_head, scale):
    """Plain-JAX reproduction of the PyTorch forward (for verification)."""
    B, N, D = x.shape
    qkv = x @ w_qkv                                  # (B, N, 3*inner)
    q, k, v = jnp.split(qkv, 3, axis=-1)

    def split_heads(t):                              # 'b n (h d) -> b h n d'
        return t.reshape(B, N, heads, dim_head).transpose(0, 2, 1, 3)

    q, k, v = map(split_heads, (q, k, v))
    dots = jnp.einsum("bhqd,bhkd->bhqk", q, k) * scale
    attn = jax.nn.softmax(dots, axis=-1)
    out = jnp.einsum("bhqk,bhkd->bhqd", attn, v)     # (B, H, N, dh)
    out = out.transpose(0, 2, 1, 3).reshape(B, N, heads * dim_head)
    return out @ w_out + b_out                       # Dropout(p=0.0) is identity


if __name__ == "__main__":
    # Module hyper-params (PyTorch defaults: heads=8, dim_head=64, dropout=0.0)
    B, N, D = 2, 8, 32
    heads, dim_head = 8, 64
    inner = heads * dim_head
    scale = dim_head ** (-0.5)

    key = jax.random.PRNGKey(0)
    k_x, k_qkv, k_o, k_b = jax.random.split(key, 4)

    x = jax.random.normal(k_x, (B, N, D), dtype=jnp.float32)

    # Deterministic "PyTorch-Linear-like" init (uniform +/- 1/sqrt(fan_in)).
    # to_qkv: Linear(D, 3*inner, bias=False) -> stored transposed as (D, 3*inner)
    lim_qkv = 1.0 / np.sqrt(D)
    w_qkv = jax.random.uniform(k_qkv, (D, 3 * inner),
                               minval=-lim_qkv, maxval=lim_qkv,
                               dtype=jnp.float32)
    # to_out[0]: Linear(inner, D) with bias -> stored transposed as (inner, D)
    lim_o = 1.0 / np.sqrt(inner)
    w_out = jax.random.uniform(k_o, (inner, D),
                               minval=-lim_o, maxval=lim_o, dtype=jnp.float32)
    b_out = jax.random.uniform(k_b, (1, D),
                               minval=-lim_o, maxval=lim_o, dtype=jnp.float32)

    out = attention_pallas(x, w_qkv, w_out, b_out,
                           heads=heads, dim_head=dim_head, scale=scale)
    out = jax.block_until_ready(out)

    ref = attention_reference(x, w_qkv, w_out, b_out,
                              heads=heads, dim_head=dim_head, scale=scale)
    ref = jax.block_until_ready(ref)

    # approx=True EUP reciprocal in the softmax denom has ~1e-4 relative error
    # vs the exact divide in the reference, hence the slightly looser tolerance.
    np.testing.assert_allclose(np.asarray(out), np.asarray(ref),
                               rtol=2e-3, atol=2e-3)
    print("KERNEL_OK")
</pallas_src>

<mosaic_0001>
module attributes {stable_mosaic.version = 11 : i64} {
  func.func @_attention_kernel(%arg0: i32, %arg1: memref<1x8x32xf32, #tpu.memory_space<vmem>>, %arg2: memref<32x1536xf32, #tpu.memory_space<vmem>>, %arg3: memref<512x32xf32, #tpu.memory_space<vmem>>, %arg4: memref<1x32xf32, #tpu.memory_space<vmem>>, %arg5: memref<1x8x32xf32, #tpu.memory_space<vmem>>, %arg6: memref<8x512xf32, #tpu.memory_space<vmem>>) attributes {dimension_semantics = [#tpu.dimension_semantics<parallel>], iteration_bounds = array<i64: 2>, scalar_prefetch = 0 : i64, scratch_operands = 1 : i64, tpu.core_type = #tpu.core_type<tc>, window_params = [{transform_indices = @transform_0, window_bounds = array<i64: 1, 8, 32>}, {pipeline_mode = #tpu.pipeline_mode<synchronous>, transform_indices = @transform_1, window_bounds = array<i64: 32, 1536>}, {pipeline_mode = #tpu.pipeline_mode<synchronous>, transform_indices = @transform_2, window_bounds = array<i64: 512, 32>}, {pipeline_mode = #tpu.pipeline_mode<synchronous>, transform_indices = @transform_3, window_bounds = array<i64: 1, 32>}, {transform_indices = @transform_4, window_bounds = array<i64: 1, 8, 32>}]} {
    %c0 = arith.constant 0 : index
    %c0_0 = arith.constant 0 : index
    %c0_1 = arith.constant 0 : index
    %0 = vector.load %arg1[%c0, %c0_0, %c0_1] : memref<1x8x32xf32, #tpu.memory_space<vmem>>, vector<1x8x32xf32>
    %1 = vector.shape_cast %0 : vector<1x8x32xf32> to vector<8x32xf32>
    %c0_2 = arith.constant 0 : index
    %c0_3 = arith.constant 0 : index
    %2 = vector.load %arg2[%c0_2, %c0_3] : memref<32x1536xf32, #tpu.memory_space<vmem>>, vector<32x1536xf32>
    %cst = arith.constant dense<0.000000e+00> : vector<8x1536xf32>
    %3 = tpu.matmul %1, %2, %cst {dimension_numbers = #tpu.dot_dimension_numbers<[1], [0], [0], [1], [0, 0, 1, 1], [], []>} : vector<8x32xf32>, vector<32x1536xf32>, vector<8x1536xf32> -> vector<8x1536xf32>
    %4 = vector.extract_strided_slice %3 {offsets = [0, 0], sizes = [8, 64], strides = [1, 1]} : vector<8x1536xf32> to vector<8x64xf32>
    %5 = vector.extract_strided_slice %3 {offsets = [0, 512], sizes = [8, 64], strides = [1, 1]} : vector<8x1536xf32> to vector<8x64xf32>
    %6 = vector.extract_strided_slice %3 {offsets = [0, 1024], sizes = [8, 64], strides = [1, 1]} : vector<8x1536xf32> to vector<8x64xf32>
    %cst_4 = arith.constant dense<0.000000e+00> : vector<8x8xf32>
    %7 = tpu.matmul %4, %5, %cst_4 {dimension_numbers = #tpu.dot_dimension_numbers<[1], [1], [0], [0], [0, 0, 1, 0], [], []>} : vector<8x64xf32>, vector<8x64xf32>, vector<8x8xf32> -> vector<8x8xf32>
    %cst_5 = arith.constant 1.250000e-01 : f32
    %8 = vector.broadcast %cst_5 : f32 to vector<8x8xf32>
    %9 = arith.mulf %7, %8 : vector<8x8xf32>
    %cst_6 = arith.constant dense<0xFF800000> : vector<8xf32>
    %10 = vector.multi_reduction <maximumf>, %9, %cst_6 [1] : vector<8x8xf32> to vector<8xf32>
    %11 = vector.shape_cast %10 : vector<8xf32> to vector<8x1xf32>
    %12 = vector.broadcast %11 : vector<8x1xf32> to vector<8x8xf32>
    %13 = arith.subf %9, %12 : vector<8x8xf32>
    %14 = math.exp %13 : vector<8x8xf32>
    %cst_7 = arith.constant dense<0.000000e+00> : vector<8xf32>
    %15 = vector.multi_reduction <add>, %14, %cst_7 [1] : vector<8x8xf32> to vector<8xf32>
    %16 = vector.shape_cast %15 : vector<8xf32> to vector<8x1xf32>
    %17 = tpu.reciprocal %16 {approx = true} : vector<8x1xf32> -> vector<8x1xf32>
    %18 = vector.broadcast %17 : vector<8x1xf32> to vector<8x8xf32>
    %19 = arith.mulf %14, %18 : vector<8x8xf32>
    %cst_8 = arith.constant dense<0.000000e+00> : vector<8x64xf32>
    %20 = tpu.matmul %19, %6, %cst_8 {dimension_numbers = #tpu.dot_dimension_numbers<[1], [0], [0], [1], [0, 0, 1, 1], [], []>} : vector<8x8xf32>, vector<8x64xf32>, vector<8x64xf32> -> vector<8x64xf32>
    %c0_9 = arith.constant 0 : index
    %c0_10 = arith.constant 0 : index
    %21 = vector.load %arg6[%c0_9, %c0_10] : memref<8x512xf32, #tpu.memory_space<vmem>>, vector<8x64xf32>
    tpu.vector_store %arg6[%c0_9, %c0_10], %20 {strides = array<i32>} : memref<8x512xf32, #tpu.memory_space<vmem>>, vector<8x64xf32>,
    %22 = vector.extract_strided_slice %3 {offsets = [0, 64], sizes = [8, 64], strides = [1, 1]} : vector<8x1536xf32> to vector<8x64xf32>
    %23 = vector.extract_strided_slice %3 {offsets = [0, 576], sizes = [8, 64], strides = [1, 1]} : vector<8x1536xf32> to vector<8x64xf32>
    %24 = vector.extract_strided_slice %3 {offsets = [0, 1088], sizes = [8, 64], strides = [1, 1]} : vector<8x1536xf32> to vector<8x64xf32>
    %cst_11 = arith.constant dense<0.000000e+00> : vector<8x8xf32>
    %25 = tpu.matmul %22, %23, %cst_11 {dimension_numbers = #tpu.dot_dimension_numbers<[1], [1], [0], [0], [0, 0, 1, 0], [], []>} : vector<8x64xf32>, vector<8x64xf32>, vector<8x8xf32> -> vector<8x8xf32>
    %cst_12 = arith.constant 1.250000e-01 : f32
    %26 = vector.broadcast %cst_12 : f32 to vector<8x8xf32>
    %27 = arith.mulf %25, %26 : vector<8x8xf32>
    %cst_13 = arith.constant dense<0xFF800000> : vector<8xf32>
    %28 = vector.multi_reduction <maximumf>, %27, %cst_13 [1] : vector<8x8xf32> to vector<8xf32>
    %29 = vector.shape_cast %28 : vector<8xf32> to vector<8x1xf32>
    %30 = vector.broadcast %29 : vector<8x1xf32> to vector<8x8xf32>
    %31 = arith.subf %27, %30 : vector<8x8xf32>
    %32 = math.exp %31 : vector<8x8xf32>
    %cst_14 = arith.constant dense<0.000000e+00> : vector<8xf32>
    %33 = vector.multi_reduction <add>, %32, %cst_14 [1] : vector<8x8xf32> to vector<8xf32>
    %34 = vector.shape_cast %33 : vector<8xf32> to vector<8x1xf32>
    %35 = tpu.reciprocal %34 {approx = true} : vector<8x1xf32> -> vector<8x1xf32>
    %36 = vector.broadcast %35 : vector<8x1xf32> to vector<8x8xf32>
    %37 = arith.mulf %32, %36 : vector<8x8xf32>
    %cst_15 = arith.constant dense<0.000000e+00> : vector<8x64xf32>
    %38 = tpu.matmul %37, %24, %cst_15 {dimension_numbers = #tpu.dot_dimension_numbers<[1], [0], [0], [1], [0, 0, 1, 1], [], []>} : vector<8x8xf32>, vector<8x64xf32>, vector<8x64xf32> -> vector<8x64xf32>
    %c0_16 = arith.constant 0 : index
    %c64 = arith.constant 64 : index
    %39 = vector.load %arg6[%c0_16, %c64] : memref<8x512xf32, #tpu.memory_space<vmem>>, vector<8x64xf32>
    tpu.vector_store %arg6[%c0_16, %c64], %38 {strides = array<i32>} : memref<8x512xf32, #tpu.memory_space<vmem>>, vector<8x64xf32>,
    %40 = vector.extract_strided_slice %3 {offsets = [0, 128], sizes = [8, 64], strides = [1, 1]} : vector<8x1536xf32> to vector<8x64xf32>
    %41 = vector.extract_strided_slice %3 {offsets = [0, 640], sizes = [8, 64], strides = [1, 1]} : vector<8x1536xf32> to vector<8x64xf32>
    %42 = vector.extract_strided_slice %3 {offsets = [0, 1152], sizes = [8, 64], strides = [1, 1]} : vector<8x1536xf32> to vector<8x64xf32>
    %cst_17 = arith.constant dense<0.000000e+00> : vector<8x8xf32>
    %43 = tpu.matmul %40, %41, %cst_17 {dimension_numbers = #tpu.dot_dimension_numbers<[1], [1], [0], [0], [0, 0, 1, 0], [], []>} : vector<8x64xf32>, vector<8x64xf32>, vector<8x8xf32> -> vector<8x8xf32>
    %cst_18 = arith.constant 1.250000e-01 : f32
    %44 = vector.broadcast %cst_18 : f32 to vector<8x8xf32>
    %45 = arith.mulf %43, %44 : vector<8x8xf32>
    %cst_19 = arith.constant dense<0xFF800000> : vector<8xf32>
    %46 = vector.multi_reduction <maximumf>, %45, %cst_19 [1] : vector<8x8xf32> to vector<8xf32>
    %47 = vector.shape_cast %46 : vector<8xf32> to vector<8x1xf32>
    %48 = vector.broadcast %47 : vector<8x1xf32> to vector<8x8xf32>
    %49 = arith.subf %45, %48 : vector<8x8xf32>
    %50 = math.exp %49 : vector<8x8xf32>
    %cst_20 = arith.constant dense<0.000000e+00> : vector<8xf32>
    %51 = vector.multi_reduction <add>, %50, %cst_20 [1] : vector<8x8xf32> to vector<8xf32>
    %52 = vector.shape_cast %51 : vector<8xf32> to vector<8x1xf32>
    %53 = tpu.reciprocal %52 {approx = true} : vector<8x1xf32> -> vector<8x1xf32>
    %54 = vector.broadcast %53 : vector<8x1xf32> to vector<8x8xf32>
    %55 = arith.mulf %50, %54 : vector<8x8xf32>
    %cst_21 = arith.constant dense<0.000000e+00> : vector<8x64xf32>
    %56 = tpu.matmul %55, %42, %cst_21 {dimension_numbers = #tpu.dot_dimension_numbers<[1], [0], [0], [1], [0, 0, 1, 1], [], []>} : vector<8x8xf32>, vector<8x64xf32>, vector<8x64xf32> -> vector<8x64xf32>
    %c0_22 = arith.constant 0 : index
    %c128 = arith.constant 128 : index
    %57 = vector.load %arg6[%c0_22, %c128] : memref<8x512xf32, #tpu.memory_space<vmem>>, vector<8x64xf32>
    tpu.vector_store %arg6[%c0_22, %c128], %56 {strides = array<i32>} : memref<8x512xf32, #tpu.memory_space<vmem>>, vector<8x64xf32>,
    %58 = vector.extract_strided_slice %3 {offsets = [0, 192], sizes = [8, 64], strides = [1, 1]} : vector<8x1536xf32> to vector<8x64xf32>
    %59 = vector.extract_strided_slice %3 {offsets = [0, 704], sizes = [8, 64], strides = [1, 1]} : vector<8x1536xf32> to vector<8x64xf32>
    %60 = vector.extract_strided_slice %3 {offsets = [0, 1216], sizes = [8, 64], strides = [1, 1]} : vector<8x1536xf32> to vector<8x64xf32>
    %cst_23 = arith.constant dense<0.000000e+00> : vector<8x8xf32>
    %61 = tpu.matmul %58, %59, %cst_23 {dimension_numbers = #tpu.dot_dimension_numbers<[1], [1], [0], [0], [0, 0, 1, 0], [], []>} : vector<8x64xf32>, vector<8x64xf32>, vector<8x8xf32> -> vector<8x8xf32>
    %cst_24 = arith.constant 1.250000e-01 : f32
    %62 = vector.broadcast %cst_24 : f32 to vector<8x8xf32>
    %63 = arith.mulf %61, %62 : vector<8x8xf32>
    %cst_25 = arith.constant dense<0xFF800000> : vector<8xf32>
    %64 = vector.multi_reduction <maximumf>, %63, %cst_25 [1] : vector<8x8xf32> to vector<8xf32>
    %65 = vector.shape_cast %64 : vector<8xf32> to vector<8x1xf32>
    %66 = vector.broadcast %65 : vector<8x1xf32> to vector<8x8xf32>
    %67 = arith.subf %63, %66 : vector<8x8xf32>
    %68 = math.exp %67 : vector<8x8xf32>
    %cst_26 = arith.constant dense<0.000000e+00> : vector<8xf32>
    %69 = vector.multi_reduction <add>, %68, %cst_26 [1] : vector<8x8xf32> to vector<8xf32>
    %70 = vector.shape_cast %69 : vector<8xf32> to vector<8x1xf32>
    %71 = tpu.reciprocal %70 {approx = true} : vector<8x1xf32> -> vector<8x1xf32>
    %72 = vector.broadcast %71 : vector<8x1xf32> to vector<8x8xf32>
    %73 = arith.mulf %68, %72 : vector<8x8xf32>
    %cst_27 = arith.constant dense<0.000000e+00> : vector<8x64xf32>
    %74 = tpu.matmul %73, %60, %cst_27 {dimension_numbers = #tpu.dot_dimension_numbers<[1], [0], [0], [1], [0, 0, 1, 1], [], []>} : vector<8x8xf32>, vector<8x64xf32>, vector<8x64xf32> -> vector<8x64xf32>
    %c0_28 = arith.constant 0 : index
    %c192 = arith.constant 192 : index
    %75 = vector.load %arg6[%c0_28, %c192] : memref<8x512xf32, #tpu.memory_space<vmem>>, vector<8x64xf32>
    tpu.vector_store %arg6[%c0_28, %c192], %74 {strides = array<i32>} : memref<8x512xf32, #tpu.memory_space<vmem>>, vector<8x64xf32>,
    %76 = vector.extract_strided_slice %3 {offsets = [0, 256], sizes = [8, 64], strides = [1, 1]} : vector<8x1536xf32> to vector<8x64xf32>
    %77 = vector.extract_strided_slice %3 {offsets = [0, 768], sizes = [8, 64], strides = [1, 1]} : vector<8x1536xf32> to vector<8x64xf32>
    %78 = vector.extract_strided_slice %3 {offsets = [0, 1280], sizes = [8, 64], strides = [1, 1]} : vector<8x1536xf32> to vector<8x64xf32>
    %cst_29 = arith.constant dense<0.000000e+00> : vector<8x8xf32>
    %79 = tpu.matmul %76, %77, %cst_29 {dimension_numbers = #tpu.dot_dimension_numbers<[1], [1], [0], [0], [0, 0, 1, 0], [], []>} : vector<8x64xf32>, vector<8x64xf32>, vector<8x8xf32> -> vector<8x8xf32>
    %cst_30 = arith.constant 1.250000e-01 : f32
    %80 = vector.broadcast %cst_30 : f32 to vector<8x8xf32>
    %81 = arith.mulf %79, %80 : vector<8x8xf32>
    %cst_31 = arith.constant dense<0xFF800000> : vector<8xf32>
    %82 = vector.multi_reduction <maximumf>, %81, %cst_31 [1] : vector<8x8xf32> to vector<8xf32>
    %83 = vector.shape_cast %82 : vector<8xf32> to vector<8x1xf32>
    %84 = vector.broadcast %83 : vector<8x1xf32> to vector<8x8xf32>
    %85 = arith.subf %81, %84 : vector<8x8xf32>
    %86 = math.exp %85 : vector<8x8xf32>
    %cst_32 = arith.constant dense<0.000000e+00> : vector<8xf32>
    %87 = vector.multi_reduction <add>, %86, %cst_32 [1] : vector<8x8xf32> to vector<8xf32>
    %88 = vector.shape_cast %87 : vector<8xf32> to vector<8x1xf32>
    %89 = tpu.reciprocal %88 {approx = true} : vector<8x1xf32> -> vector<8x1xf32>
    %90 = vector.broadcast %89 : vector<8x1xf32> to vector<8x8xf32>
    %91 = arith.mulf %86, %90 : vector<8x8xf32>
    %cst_33 = arith.constant dense<0.000000e+00> : vector<8x64xf32>
    %92 = tpu.matmul %91, %78, %cst_33 {dimension_numbers = #tpu.dot_dimension_numbers<[1], [0], [0], [1], [0, 0, 1, 1], [], []>} : vector<8x8xf32>, vector<8x64xf32>, vector<8x64xf32> -> vector<8x64xf32>
    %c0_34 = arith.constant 0 : index
    %c256 = arith.constant 256 : index
    %93 = vector.load %arg6[%c0_34, %c256] : memref<8x512xf32, #tpu.memory_space<vmem>>, vector<8x64xf32>
    tpu.vector_store %arg6[%c0_34, %c256], %92 {strides = array<i32>} : memref<8x512xf32, #tpu.memory_space<vmem>>, vector<8x64xf32>,
    %94 = vector.extract_strided_slice %3 {offsets = [0, 320], sizes = [8, 64], strides = [1, 1]} : vector<8x1536xf32> to vector<8x64xf32>
    %95 = vector.extract_strided_slice %3 {offsets = [0, 832], sizes = [8, 64], strides = [1, 1]} : vector<8x1536xf32> to vector<8x64xf32>
    %96 = vector.extract_strided_slice %3 {offsets = [0, 1344], sizes = [8, 64], strides = [1, 1]} : vector<8x1536xf32> to vector<8x64xf32>
    %cst_35 = arith.constant dense<0.000000e+00> : vector<8x8xf32>
    %97 = tpu.matmul %94, %95, %cst_35 {dimension_numbers = #tpu.dot_dimension_numbers<[1], [1], [0], [0], [0, 0, 1, 0], [], []>} : vector<8x64xf32>, vector<8x64xf32>, vector<8x8xf32> -> vector<8x8xf32>
    %cst_36 = arith.constant 1.250000e-01 : f32
    %98 = vector.broadcast %cst_36 : f32 to vector<8x8xf32>
    %99 = arith.mulf %97, %98 : vector<8x8xf32>
    %cst_37 = arith.constant dense<0xFF800000> : vector<8xf32>
    %100 = vector.multi_reduction <maximumf>, %99, %cst_37 [1] : vector<8x8xf32> to vector<8xf32>
    %101 = vector.shape_cast %100 : vector<8xf32> to vector<8x1xf32>
    %102 = vector.broadcast %101 : vector<8x1xf32> to vector<8x8xf32>
    %103 = arith.subf %99, %102 : vector<8x8xf32>
    %104 = math.exp %103 : vector<8x8xf32>
    %cst_38 = arith.constant dense<0.000000e+00> : vector<8xf32>
    %105 = vector.multi_reduction <add>, %104, %cst_38 [1] : vector<8x8xf32> to vector<8xf32>
    %106 = vector.shape_cast %105 : vector<8xf32> to vector<8x1xf32>
    %107 = tpu.reciprocal %106 {approx = true} : vector<8x1xf32> -> vector<8x1xf32>
    %108 = vector.broadcast %107 : vector<8x1xf32> to vector<8x8xf32>
    %109 = arith.mulf %104, %108 : vector<8x8xf32>
    %cst_39 = arith.constant dense<0.000000e+00> : vector<8x64xf32>
    %110 = tpu.matmul %109, %96, %cst_39 {dimension_numbers = #tpu.dot_dimension_numbers<[1], [0], [0], [1], [0, 0, 1, 1], [], []>} : vector<8x8xf32>, vector<8x64xf32>, vector<8x64xf32> -> vector<8x64xf32>
    %c0_40 = arith.constant 0 : index
    %c320 = arith.constant 320 : index
    %111 = vector.load %arg6[%c0_40, %c320] : memref<8x512xf32, #tpu.memory_space<vmem>>, vector<8x64xf32>
    tpu.vector_store %arg6[%c0_40, %c320], %110 {strides = array<i32>} : memref<8x512xf32, #tpu.memory_space<vmem>>, vector<8x64xf32>,
    %112 = vector.extract_strided_slice %3 {offsets = [0, 384], sizes = [8, 64], strides = [1, 1]} : vector<8x1536xf32> to vector<8x64xf32>
    %113 = vector.extract_strided_slice %3 {offsets = [0, 896], sizes = [8, 64], strides = [1, 1]} : vector<8x1536xf32> to vector<8x64xf32>
    %114 = vector.extract_strided_slice %3 {offsets = [0, 1408], sizes = [8, 64], strides = [1, 1]} : vector<8x1536xf32> to vector<8x64xf32>
    %cst_41 = arith.constant dense<0.000000e+00> : vector<8x8xf32>
    %115 = tpu.matmul %112, %113, %cst_41 {dimension_numbers = #tpu.dot_dimension_numbers<[1], [1], [0], [0], [0, 0, 1, 0], [], []>} : vector<8x64xf32>, vector<8x64xf32>, vector<8x8xf32> -> vector<8x8xf32>
    %cst_42 = arith.constant 1.250000e-01 : f32
    %116 = vector.broadcast %cst_42 : f32 to vector<8x8xf32>
    %117 = arith.mulf %115, %116 : vector<8x8xf32>
    %cst_43 = arith.constant dense<0xFF800000> : vector<8xf32>
    %118 = vector.multi_reduction <maximumf>, %117, %cst_43 [1] : vector<8x8xf32> to vector<8xf32>
    %119 = vector.shape_cast %118 : vector<8xf32> to vector<8x1xf32>
    %120 = vector.broadcast %119 : vector<8x1xf32> to vector<8x8xf32>
    %121 = arith.subf %117, %120 : vector<8x8xf32>
    %122 = math.exp %121 : vector<8x8xf32>
    %cst_44 = arith.constant dense<0.000000e+00> : vector<8xf32>
    %123 = vector.multi_reduction <add>, %122, %cst_44 [1] : vector<8x8xf32> to vector<8xf32>
    %124 = vector.shape_cast %123 : vector<8xf32> to vector<8x1xf32>
    %125 = tpu.reciprocal %124 {approx = true} : vector<8x1xf32> -> vector<8x1xf32>
    %126 = vector.broadcast %125 : vector<8x1xf32> to vector<8x8xf32>
    %127 = arith.mulf %122, %126 : vector<8x8xf32>
    %cst_45 = arith.constant dense<0.000000e+00> : vector<8x64xf32>
    %128 = tpu.matmul %127, %114, %cst_45 {dimension_numbers = #tpu.dot_dimension_numbers<[1], [0], [0], [1], [0, 0, 1, 1], [], []>} : vector<8x8xf32>, vector<8x64xf32>, vector<8x64xf32> -> vector<8x64xf32>
    %c0_46 = arith.constant 0 : index
    %c384 = arith.constant 384 : index
    %129 = vector.load %arg6[%c0_46, %c384] : memref<8x512xf32, #tpu.memory_space<vmem>>, vector<8x64xf32>
    tpu.vector_store %arg6[%c0_46, %c384], %128 {strides = array<i32>} : memref<8x512xf32, #tpu.memory_space<vmem>>, vector<8x64xf32>,
    %130 = vector.extract_strided_slice %3 {offsets = [0, 448], sizes = [8, 64], strides = [1, 1]} : vector<8x1536xf32> to vector<8x64xf32>
    %131 = vector.extract_strided_slice %3 {offsets = [0, 960], sizes = [8, 64], strides = [1, 1]} : vector<8x1536xf32> to vector<8x64xf32>
    %132 = vector.extract_strided_slice %3 {offsets = [0, 1472], sizes = [8, 64], strides = [1, 1]} : vector<8x1536xf32> to vector<8x64xf32>
    %cst_47 = arith.constant dense<0.000000e+00> : vector<8x8xf32>
    %133 = tpu.matmul %130, %131, %cst_47 {dimension_numbers = #tpu.dot_dimension_numbers<[1], [1], [0], [0], [0, 0, 1, 0], [], []>} : vector<8x64xf32>, vector<8x64xf32>, vector<8x8xf32> -> vector<8x8xf32>
    %cst_48 = arith.constant 1.250000e-01 : f32
    %134 = vector.broadcast %cst_48 : f32 to vector<8x8xf32>
    %135 = arith.mulf %133, %134 : vector<8x8xf32>
    %cst_49 = arith.constant dense<0xFF800000> : vector<8xf32>
    %136 = vector.multi_reduction <maximumf>, %135, %cst_49 [1] : vector<8x8xf32> to vector<8xf32>
    %137 = vector.shape_cast %136 : vector<8xf32> to vector<8x1xf32>
    %138 = vector.broadcast %137 : vector<8x1xf32> to vector<8x8xf32>
    %139 = arith.subf %135, %138 : vector<8x8xf32>
    %140 = math.exp %139 : vector<8x8xf32>
    %cst_50 = arith.constant dense<0.000000e+00> : vector<8xf32>
    %141 = vector.multi_reduction <add>, %140, %cst_50 [1] : vector<8x8xf32> to vector<8xf32>
    %142 = vector.shape_cast %141 : vector<8xf32> to vector<8x1xf32>
    %143 = tpu.reciprocal %142 {approx = true} : vector<8x1xf32> -> vector<8x1xf32>
    %144 = vector.broadcast %143 : vector<8x1xf32> to vector<8x8xf32>
    %145 = arith.mulf %140, %144 : vector<8x8xf32>
    %cst_51 = arith.constant dense<0.000000e+00> : vector<8x64xf32>
    %146 = tpu.matmul %145, %132, %cst_51 {dimension_numbers = #tpu.dot_dimension_numbers<[1], [0], [0], [1], [0, 0, 1, 1], [], []>} : vector<8x8xf32>, vector<8x64xf32>, vector<8x64xf32> -> vector<8x64xf32>
    %c0_52 = arith.constant 0 : index
    %c448 = arith.constant 448 : index
    %147 = vector.load %arg6[%c0_52, %c448] : memref<8x512xf32, #tpu.memory_space<vmem>>, vector<8x64xf32>
    tpu.vector_store %arg6[%c0_52, %c448], %146 {strides = array<i32>} : memref<8x512xf32, #tpu.memory_space<vmem>>, vector<8x64xf32>,
    %c0_53 = arith.constant 0 : index
    %c0_54 = arith.constant 0 : index
    %148 = vector.load %arg6[%c0_53, %c0_54] : memref<8x512xf32, #tpu.memory_space<vmem>>, vector<8x512xf32>
    %c0_55 = arith.constant 0 : index
    %c0_56 = arith.constant 0 : index
    %149 = vector.load %arg3[%c0_55, %c0_56] : memref<512x32xf32, #tpu.memory_space<vmem>>, vector<512x32xf32>
    %cst_57 = arith.constant dense<0.000000e+00> : vector<8x32xf32>
    %150 = tpu.matmul %148, %149, %cst_57 {dimension_numbers = #tpu.dot_dimension_numbers<[1], [0], [0], [1], [0, 0, 1, 1], [], []>} : vector<8x512xf32>, vector<512x32xf32>, vector<8x32xf32> -> vector<8x32xf32>
    %c0_58 = arith.constant 0 : index
    %c0_59 = arith.constant 0 : index
    %151 = vector.load %arg4[%c0_58, %c0_59] : memref<1x32xf32, #tpu.memory_space<vmem>>, vector<1x32xf32>
    %152 = vector.broadcast %151 : vector<1x32xf32> to vector<8x32xf32>
    %153 = arith.addf %150, %152 : vector<8x32xf32>
    %c0_60 = arith.constant 0 : index
    %c0_61 = arith.constant 0 : index
    %c0_62 = arith.constant 0 : index
    %154 = vector.load %arg5[%c0_60, %c0_61, %c0_62] : memref<1x8x32xf32, #tpu.memory_space<vmem>>, vector<1x8x32xf32>
    %155 = vector.shape_cast %154 : vector<1x8x32xf32> to vector<8x32xf32>
    %156 = vector.shape_cast %153 : vector<8x32xf32> to vector<1x8x32xf32>
    tpu.vector_store %arg5[%c0_60, %c0_61, %c0_62], %156 {strides = array<i32>} : memref<1x8x32xf32, #tpu.memory_space<vmem>>, vector<1x8x32xf32>,
    return
  }
  func.func @transform_0(%arg0: i32) -> (i32, i32, i32) {
    %c0_i32 = arith.constant 0 : i32
    %c0_i32_0 = arith.constant 0 : i32
    %c0_i32_1 = arith.constant 0 : i32
    return %arg0, %c0_i32, %c0_i32_0 : i32, i32, i32
  }
  func.func @transform_1(%arg0: i32) -> (i32, i32) {
    %c0_i32 = arith.constant 0 : i32
    %c0_i32_0 = arith.constant 0 : i32
    %c0_i32_1 = arith.constant 0 : i32
    return %c0_i32, %c0_i32_0 : i32, i32
  }
  func.func @transform_2(%arg0: i32) -> (i32, i32) {
    %c0_i32 = arith.constant 0 : i32
    %c0_i32_0 = arith.constant 0 : i32
    %c0_i32_1 = arith.constant 0 : i32
    return %c0_i32, %c0_i32_0 : i32, i32
  }
  func.func @transform_3(%arg0: i32) -> (i32, i32) {
    %c0_i32 = arith.constant 0 : i32
    %c0_i32_0 = arith.constant 0 : i32
    %c0_i32_1 = arith.constant 0 : i32
    return %c0_i32, %c0_i32_0 : i32, i32
  }
  func.func @transform_4(%arg0: i32) -> (i32, i32, i32) {
    %c0_i32 = arith.constant 0 : i32
    %c0_i32_0 = arith.constant 0 : i32
    %c0_i32_1 = arith.constant 0 : i32
    return %arg0, %c0_i32, %c0_i32_0 : i32, i32, i32
  }
}

</mosaic_0001>

<bundles_post_ra>
// kernel: tpu_custom_call.1
= control target key start
LH: loop header
LB: loop body
LE: loop exit
PB: predicated region body
PF: predicated region fallthrough
CT: control target
= control target key end

     0   :  { %9 = vsyncpa [#allocation4], 0  ;;  %s3398_s0 = inlined_call_operand.vmem [shape: f32[2,8,32], index: 0, kind: input, shape index: {}]   ;;  %s3399_s1 = inlined_call_operand.vmem [shape: f32[32,1536], index: 1, kind: input, shape index: {}]   ;;  %s3400_s2 = inlined_call_operand.vmem [shape: f32[512,32], index: 2, kind: input, shape index: {}]   ;;  %s3401_s3 = inlined_call_operand.vmem [shape: f32[1,32], index: 3, kind: input, shape index: {}]   ;;  %s3402_s4 = inlined_call_operand.hbm [shape: f32[2,8,32], index: 4, kind: output, shape index: {}]  }
   0x1   :  { %11 = vsyncpa [#allocation4 + $0x1], 0  ;;  %s2802_s15 = smov 0   ;;  %s2804_s16 = smov 0  }
   0x2   :  { %s2806_s17 = smov 0   ;;  %s2808_s18 = smov 0  }
   0x3 LB: > { %s2823_s19 = sadd.s32 4294967295, %s2771_s18   ;;  %s2300_s20 = sadd.s32 4294967294, %s2771_s18   ;;  %s2771_s18 = sphi %s2808_s18, %s3408_s18   ;;  %s2767_s17 = sphi %s2806_s17, %s3407_s17   ;;  %s2763_s16 = sphi %s2804_s16, %s3406_s16   ;;  %s2759_s15 = sphi %s2802_s15, %s3405_s15  }
   0x4   : > { %s2827_s21 = sadd.s32 1, %s2771_s18   ;;  %s113_s22 = sadd.s32 1, %s2767_s17 }
   0x5   : > { %s110_s23 = ssub.s32 %s2771_s18, %s2827_s21  ;;  %p123_p0 = scmp.ne.s32.totalorder %s2767_s17, %s2763_s16 }
   0x6   : > { %p111_p1 = scmp.eq.s32.totalorder %s110_s23, 0  ;;  %p124_p2 = scmp.eq.s32.totalorder %s2823_s19, 1 }
   0x7   : > { %p129_p3 = scmp.ne.s32.totalorder %s2763_s16, %s2759_s15  ;;  %p130_p4 = scmp.eq.s32.totalorder %s2300_s20, 1 }
   0x8   : > { %s2838_s24 = scalar_select %p111_p1, %s2767_s17, %s113_s22  }
   0x9   : > { %p2840_p5 = por %p124_p2, %p123_p0  ;;  %p2844_p6 = por %p130_p4, %p129_p3 }
   0xa   : > { %p2303_p7 = scmp.ge.s32.totalorder %s2771_s18, 1  ;;  %p164_p8 = scmp.lt.s32.totalorder %s2771_s18, 3 }
   0xc   : > { %p165_p9 = pnand %p2303_p7, %p164_p8 }
   0xd   : > { %v195_v0 = vld [vmem:[%s3399_s1 + $0x8] sm:$0xff] (!%p165_p9)  ;;  %v194_v2 = vld [vmem:[%s3399_s1] sm:$0xff] (!%p165_p9)  ;;  %p189_p10 = scmp.lt.s32.totalorder (!%p165_p9), %s2823_s19, 1  ;;  %v2773_v7 = vmov (!%p165_p9), 0.0   ;;  %v197_v17 = vld [vmem:[%s3399_s1 + $0x18] sm:$0xff] (!%p165_p9)  ;;  %vm242_vm0 = vcmask (!%p165_p9), 261120  }
   0xe   : > { %168 = sbr.rel (%p165_p9) target bundleno = 1492 (0x5d4), region = 36  ;;  %v207_v1 = vld [vmem:[%s3399_s1 + $0x68] sm:$0xff] (!%p165_p9)  ;;  %v206_v4 = vld [vmem:[%s3399_s1 + $0x60] sm:$0xff] (!%p165_p9)  ;;  %310 = vmatprep.mubr.f32.mxu0 (!%p165_p9), %v2773_v7  ;;  %381 = vmatprep.mubr.f32.mxu1 (!%p165_p9), %v2773_v7  ;;  %v209_v21 = vld [vmem:[%s3399_s1 + $0x78] sm:$0xff] (!%p165_p9)  ;;  %vm2774_vm1 = vmmov (!%p165_p9), 0   ;;  %vm672_vm2 = vcmask (!%p165_p9), 523264  }
   0xf   : > { %v2523_v3 = vpack.c.bf16 (!%p165_p9), %v207_v1, %v195_v0  ;;  %v219_v5 = vld [vmem:[%s3399_s1 + $0xc8] sm:$0xff] (!%p165_p9)  ;;  %v2525_v8 = vpack.c.bf16 (!%p165_p9), %v206_v4, %v194_v2  ;;  %v218_v10 = vld [vmem:[%s3399_s1 + $0xc0] sm:$0xff] (!%p165_p9)  ;;  %v2531_v23 = vpack.c.bf16 (!%p165_p9), %v209_v21, %v197_v17  ;;  %v196_v24 = vld [vmem:[%s3399_s1 + $0x10] sm:$0xff] (!%p165_p9)  ;;  %s2775_s27 = smov (!%p165_p9), 64   ;;  %vm750_vm3 = vcmask (!%p165_p9), 64512   ;;  %s2338_s6 = sshll.u32 (!%p165_p9), %s2823_s19, 7 }
  0x10   : > { %v231_v6 = vld [vmem:[%s3399_s1 + $0x128] sm:$0xff] (!%p165_p9)  ;;  %v230_v11 = vld [vmem:[%s3399_s1 + $0x120] sm:$0xff] (!%p165_p9)  ;;  %v208_v25 = vld [vmem:[%s3399_s1 + $0x70] sm:$0xff] (!%p165_p9)  ;;  %vm1007_vm4 = vcmask (!%p165_p9), 1048064   ;;  %s3355_s10 = scalar_lea.hbm (!%p165_p9), %s3402_s4, %s2338_s6 }
  0x11   : > { %v2527_v9 = vpack.c.bf16 (!%p165_p9), %v231_v6, %v219_v5  ;;  %v199_v12 = vld [vmem:[%s3399_s1 + $0x28] sm:$0xff] (!%p165_p9)  ;;  %2524 = vmatprep.subr.bf16.mxu0 (!%p165_p9), %v2523_v3  ;;  %v2529_v14 = vpack.c.bf16 (!%p165_p9), %v230_v11, %v218_v10  ;;  %v198_v15 = vld [vmem:[%s3399_s1 + $0x20] sm:$0xff] (!%p165_p9)  ;;  %v2533_v26 = vpack.c.bf16 (!%p165_p9), %v208_v25, %v196_v24  ;;  %v221_v27 = vld [vmem:[%s3399_s1 + $0xd8] sm:$0xff] (!%p165_p9)  ;;  %2532 = vmatprep.subr.bf16.mxu1 (!%p165_p9), %v2531_v23 }
  0x12   : > { %v211_v13 = vld [vmem:[%s3399_s1 + $0x88] sm:$0xff] (!%p165_p9)  ;;  %2526 = vmatpush1.bf16.msra.mxu0 (!%p165_p9), %v2525_v8  ;;  %v210_v16 = vld [vmem:[%s3399_s1 + $0x80] sm:$0xff] (!%p165_p9)  ;;  %v233_v28 = vld [vmem:[%s3399_s1 + $0x138] sm:$0xff] (!%p165_p9) }
  0x13   : > { %2528 = vmatprep.subr.bf16.mxu0 (!%p165_p9), %v2527_v9  ;;  %v2539_v18 = vpack.c.bf16 (!%p165_p9), %v211_v13, %v199_v12  ;;  %v223_v19 = vld [vmem:[%s3399_s1 + $0xe8] sm:$0xff] (!%p165_p9)  ;;  %v220_v29 = vld [vmem:[%s3399_s1 + $0xd0] sm:$0xff] (!%p165_p9)  ;;  %v2541_v30 = vpack.c.bf16 (!%p165_p9), %v210_v16, %v198_v15  ;;  %v2535_v31 = vpack.c.bf16 (!%p165_p9), %v233_v28, %v221_v27  ;;  %v201_v33 = vld [vmem:[%s3399_s1 + $0x38] sm:$0xff] (!%p165_p9)  ;;  %2534 = vmatpush1.bf16.msra.mxu1 (!%p165_p9), %v2533_v26 }
  0x14   : > { %v235_v20 = vld [vmem:[%s3399_s1 + $0x148] sm:$0xff] (!%p165_p9)  ;;  %v232_v32 = vld [vmem:[%s3399_s1 + $0x130] sm:$0xff] (!%p165_p9)  ;;  %v213_v34 = vld [vmem:[%s3399_s1 + $0x98] sm:$0xff] (!%p165_p9) }
  0x15   : > { %s190_s23 = scalar_select %p189_p10, %s2823_s19, 1  ;;  %v2543_v35 = vpack.c.bf16 %v235_v20, %v223_v19  ;;  %v222_v36 = vld [vmem:[%s3399_s1 + $0xe0] sm:$0xff]  ;;  %v2537_v38 = vpack.c.bf16 %v232_v32, %v220_v29  ;;  %2536 = vmatprep.subr.bf16.mxu1 %v2535_v31  ;;  %v2547_v39 = vpack.c.bf16 %v213_v34, %v201_v33  ;;  %v200_v40 = vld [vmem:[%s3399_s1 + $0x30] sm:$0xff]  ;;  %v225_v42 = vld [vmem:[%s3399_s1 + $0xf8] sm:$0xff] }
  0x16   : > { %2530 = vmatpush1.bf16.msra.mxu0 %v2529_v14  ;;  %v234_v37 = vld [vmem:[%s3399_s1 + $0x140] sm:$0xff]  ;;  %v212_v41 = vld [vmem:[%s3399_s1 + $0x90] sm:$0xff]  ;;  %v237_v43 = vld [vmem:[%s3399_s1 + $0x158] sm:$0xff]  ;;  %s2776_s19 = smov [#allocation3]  }
  0x17   : > { %s2305_s5 = sshll.u32 %s190_s23, 3  ;;  %2540 = vmatprep.subr.bf16.mxu0 %v2539_v18  ;;  %v203_v44 = vld [vmem:[%s3399_s1 + $0x48] sm:$0xff]  ;;  %v2545_v46 = vpack.c.bf16 %v234_v37, %v222_v36  ;;  %2538 = vmatpush1.bf16.msra.mxu1 %v2537_v38  ;;  %v2549_v47 = vpack.c.bf16 %v212_v41, %v200_v40  ;;  %v224_v48 = vld [vmem:[%s3399_s1 + $0xf0] sm:$0xff]  ;;  %v202_v49 = vld [vmem:[%s3399_s1 + $0x40] sm:$0xff]  ;;  %v2551_v51 = vpack.c.bf16 %v237_v43, %v225_v42  ;;  %s2713_s13 = sshll.u32 %s2776_s19, 4  ;;  %s2714_s13 = int_to_ptr.vmem [resolvable:$false] %s2713_s13 }
  0x18   : > { %s192_s14 = scalar_lea.vmem %s3398_s0, %s2305_s5  ;;  %v215_v45 = vld [vmem:[%s3399_s1 + $0xa8] sm:$0xff]  ;;  %v214_v50 = vld [vmem:[%s3399_s1 + $0xa0] sm:$0xff]  ;;  %2548 = vmatprep.subr.bf16.mxu1 %v2547_v39  ;;  %v236_v52 = vld [vmem:[%s3399_s1 + $0x150] sm:$0xff] }
  0x19   : > { %v2905_v22 = vld [vmem:[%s192_s14] sm:$0xff]  ;;  %v2555_v53 = vpack.c.bf16 %v215_v45, %v203_v44  ;;  %v227_v54 = vld [vmem:[%s3399_s1 + $0x108] sm:$0xff]  ;;  %v2557_v56 = vpack.c.bf16 %v214_v50, %v202_v49  ;;  %v2553_v57 = vpack.c.bf16 %v236_v52, %v224_v48  ;;  %v205_v9 = vld [vmem:[%s3399_s1 + $0x58] sm:$0xff]  ;;  %s2715_s14 = scalar_lea.vmem %s2714_s13, 256 }
  0x1a   : > { %2306 = vmatmul.mubr.msk.f32.vlgmr.msra.gmra.mrb[0].mxu0 %vm242_vm0, %v2905_v22  ;;  %v239_v55 = vld [vmem:[%s3399_s1 + $0x168] sm:$0xff]  ;;  %2307 = vmatmul.mubr.msk.f32.vlgmr.msra.gmra.mrb[0].mxu1 %vm242_vm0, %v2905_v22  ;;  %v226_v59 = vld [vmem:[%s3399_s1 + $0x100] sm:$0xff]  ;;  %v217_v10 = vld [vmem:[%s3399_s1 + $0xb8] sm:$0xff] }
  0x1b   : > { %2542 = vmatpush1.bf16.msra.mxu0 %v2541_v30  ;;  %452 = vmatprep.mubr.f32.mxu0 %v2773_v7  ;;  %v2559_v58 = vpack.c.bf16 %v239_v55, %v227_v54  ;;  %v238_v60 = vld [vmem:[%s3399_s1 + $0x160] sm:$0xff]  ;;  %v204_v11 = vld [vmem:[%s3399_s1 + $0x50] sm:$0xff]  ;;  %v2563_v12 = vpack.c.bf16 %v217_v10, %v205_v9  ;;  %v229_v14 = vld [vmem:[%s3399_s1 + $0x118] sm:$0xff] }
  0x1c   : > { %2544 = vmatprep.subr.bf16.mxu0 %v2543_v35  ;;  %2550 = vmatpush1.bf16.msra.mxu1 %v2549_v47  ;;  %v2561_v61 = vpack.c.bf16 %v238_v60, %v226_v59  ;;  %v216_v13 = vld [vmem:[%s3399_s1 + $0xb0] sm:$0xff]  ;;  %v241_v15 = vld [vmem:[%s3399_s1 + $0x178] sm:$0xff] }
  0x1d   : > { %523 = vmatprep.mubr.f32.mxu1 %v2773_v7  ;;  %2552 = vmatprep.subr.bf16.mxu1 %v2551_v51  ;;  %v2565_v16 = vpack.c.bf16 %v216_v13, %v204_v11  ;;  %v2567_v17 = vpack.c.bf16 %v241_v15, %v229_v14  ;;  %v228_v18 = vld [vmem:[%s3399_s1 + $0x110] sm:$0xff] }
  0x1e   : > { %v240_v19 = vld [vmem:[%s3399_s1 + $0x170] sm:$0xff] }
  0x1f   : > { %2546 = vmatpush1.bf16.msra.mxu0 %v2545_v46  ;;  %v2569_v20 = vpack.c.bf16 %v240_v19, %v228_v18 }
  0x20   : > { %2556 = vmatprep.subr.bf16.mxu0 %v2555_v53  ;;  %2554 = vmatpush1.bf16.msra.mxu1 %v2553_v57 }
  0x21   : > { %2564 = vmatprep.subr.bf16.mxu1 %v2563_v12 }
  0x22   : > { %2308 = vmatmul.mubr.msk.f32.vlgmr.msra.gmra.mrb[2].mxu0 %vm242_vm0, %v2905_v22 }
  0x23   : > { %2558 = vmatpush1.bf16.msra.mxu0 %v2557_v56  ;;  %594 = vmatprep.mubr.f32.mxu0 %v2773_v7 }
  0x24   : > { %2560 = vmatprep.subr.bf16.mxu0 %v2559_v58  ;;  %2309 = vmatmul.mubr.msk.f32.vlgmr.msra.gmra.mrb[2].mxu1 %vm242_vm0, %v2905_v22 }
  0x25   : > { %665 = vmatprep.mubr.f32.mxu1 %v2773_v7  ;;  %2566 = vmatpush1.bf16.msra.mxu1 %v2565_v16 }
  0x26   : > { %2568 = vmatprep.subr.bf16.mxu1 %v2567_v17 }
  0x27   : > { %2562 = vmatpush1.bf16.msra.mxu0 %v2561_v61 }
  0x28   : > { %2443 = vmatprep.subr.mxu0 %v2773_v7 }
  0x29   : > { %2570 = vmatpush1.bf16.msra.mxu1 %v2569_v20 }
  0x2a   : > { %2310 = vmatmul.mubr.msk.f32.vlgmr.msra.gmra.mrb[4].mxu0 %vm242_vm0, %v2905_v22  ;;  %2448 = vmatprep.subr.mxu1 %v2773_v7 }
  0x2b   : > { %2445 = vmatprep.mubr.msk.f32.mxu0 %vm2774_vm1, %v2773_v7 }
  0x2c   : > { %2311 = vmatmul.mubr.msk.f32.vlgmr.msra.gmra.mrb[4].mxu1 %vm242_vm0, %v2905_v22 }
  0x2d   : > { %2450 = vmatprep.mubr.msk.f32.mxu1 %vm2774_vm1, %v2773_v7 }
  0xed   : > { %v312_v62 = vpop.f32.mrb[0].mxu0  ;;  %v383_v0 = vpop.f32.mrb[0].mxu1 }
  0xee   : > { %v314_v63 = vpop.f32.mrb[1].mxu0  ;;  %v2996_v1 = vpop.f32.mrb[1].mxu1 }
  0xf5   : > { %v454_v2 = vpop.f32.mrb[2].mxu0 }
  0xf6   : > { %838 = vrot.lane.b32.xlu0 %v454_v2, %s2775_s27  ;;  %v456_v3 = vpop.f32.mrb[3].mxu0  ;;  %2444 = vmatpush3.xpose.msk.msra.mxu0 %vm672_vm2, %v454_v2 }
  0xf7   : > { %1173 = vrot.lane.b32.xlu1 %v456_v3, %s2775_s27  ;;  %2453 = vmatprep.subr.mxu0 %v2773_v7  ;;  %v525_v4 = vpop.f32.mrb[2].mxu1 }
  0xf8   : > { %v527_v5 = vpop.f32.mrb[3].mxu1 }
  0xf9   : > { %2446 = vmatmul.mubr.msk.f32.vlgmr.msra.gmra.mrb[6].mxu0 %vm672_vm2, %v312_v62 }
  0xfa   : > { %836 = vrot.lane.b32.xlu0 %v312_v62, %s2775_s27  ;;  %2455 = vmatprep.mubr.msk.f32.mxu0 %vm2774_vm1, %v2773_v7 }
  0xfb   : > { %1171 = vrot.lane.b32.xlu1 %v314_v63, %s2775_s27 }
  0xfd   : > { %v3012_v6 = vpop.f32.mrb[4].mxu0 }
  0xfe   : > { %1507 = vrot.lane.b32.xlu0 %v525_v4, %s2775_s27  ;;  %v3014_v8 = vpop.f32.mrb[5].mxu0  ;;  %2449 = vmatpush3.msra.mxu1 %v3012_v6 }
  0xff   : > { %1505 = vrot.lane.b32.xlu1 %v383_v0, %s2775_s27  ;;  %2458 = vmatprep.subr.mxu1 %v2773_v7  ;;  %v3091_v2 = vpop.f32.mrb[4].mxu1 }
 0x102   : > { %1841 = vrot.lane.b32.xlu0 %v527_v5, %s2775_s27 }
 0x103   : > { %1839 = vrot.lane.b32.xlu1 %v2996_v1, %s2775_s27 }
 0x168   : > { %v839_v21 = vpop.permute.xlu0 %838 }
 0x169   : > { %2454 = vmatpush3.xpose.msk.msra.mxu0 %vm672_vm2, %v839_v21  ;;  %v1174_v24 = vpop.permute.xlu1 %1173 }
 0x16a   : > { %2463 = vmatprep.subr.mxu0 %v2773_v7 }
 0x16c   : > { %v837_v23 = vpop.permute.xlu0 %836 }
 0x16d   : > { %2456 = vmatmul.mubr.msk.f32.vlgmr.msra.gmra.mrb[8].mxu0 %vm672_vm2, %v837_v23  ;;  %v1172_v22 = vpop.permute.xlu1 %1171 }
 0x16e   : > { %2464 = vmatpush3.xpose.msk.msra.mxu0 %vm672_vm2, %v456_v3  ;;  %2465 = vmatprep.mubr.msk.f32.mxu0 %vm2774_vm1, %v2773_v7  ;;  %v3093_v3 = vpop.f32.mrb[5].mxu1 }
 0x16f   : > { %2473 = vmatprep.subr.mxu0 %v2773_v7 }
 0x170   : > { %v1508_v25 = vpop.permute.xlu0 %1507 }
 0x171   : > { %2466 = vmatmul.mubr.msk.f32.vlgmr.msra.gmra.mrb[10].mxu0 %vm672_vm2, %v314_v63  ;;  %v1506_v26 = vpop.permute.xlu1 %1505 }
 0x172   : > { %2474 = vmatpush3.xpose.msk.msra.mxu0 %vm672_vm2, %v1174_v24  ;;  %2475 = vmatprep.mubr.msk.f32.mxu0 %vm2774_vm1, %v2773_v7 }
 0x173   : > { %2483 = vmatprep.subr.mxu0 %v2773_v7 }
 0x174   : > { %v1842_v27 = vpop.permute.xlu0 %1841 }
 0x175   : > { %2476 = vmatmul.mubr.msk.f32.vlgmr.msra.gmra.mrb[12].mxu0 %vm672_vm2, %v1172_v22  ;;  %v1840_v28 = vpop.permute.xlu1 %1839 }
 0x176   : > { %2484 = vmatpush3.xpose.msk.msra.mxu0 %vm672_vm2, %v525_v4  ;;  %2485 = vmatprep.mubr.msk.f32.mxu0 %vm2774_vm1, %v2773_v7 }
 0x177   : > { %2493 = vmatprep.subr.mxu0 %v2773_v7 }
 0x179   : > { %2486 = vmatmul.mubr.msk.f32.vlgmr.msra.gmra.mrb[14].mxu0 %vm672_vm2, %v383_v0 }
 0x17a   : > { %2494 = vmatpush3.xpose.msk.msra.mxu0 %vm672_vm2, %v1508_v25  ;;  %2495 = vmatprep.mubr.msk.f32.mxu0 %vm2774_vm1, %v2773_v7 }
 0x17b   : > { %2503 = vmatprep.subr.mxu0 %v2773_v7 }
 0x17d   : > { %2496 = vmatmul.mubr.msk.f32.vlgmr.msra.gmra.mrb[16].mxu0 %vm672_vm2, %v1506_v26 }
 0x17e   : > { %2504 = vmatpush3.xpose.msk.msra.mxu0 %vm672_vm2, %v527_v5  ;;  %2505 = vmatprep.mubr.msk.f32.mxu0 %vm2774_vm1, %v2773_v7 }
 0x17f   : > { %2513 = vmatprep.subr.mxu0 %v2773_v7 }
 0x181   : > { %2506 = vmatmul.mubr.msk.f32.vlgmr.msra.gmra.mrb[18].mxu0 %vm672_vm2, %v2996_v1 }
 0x182   : > { %2514 = vmatpush3.xpose.msk.msra.mxu0 %vm672_vm2, %v1842_v27  ;;  %2515 = vmatprep.mubr.msk.f32.mxu0 %vm2774_vm1, %v2773_v7 }
 0x185   : > { %2516 = vmatmul.mubr.msk.f32.vlgmr.msra.gmra.mrb[20].mxu0 %vm672_vm2, %v1840_v28 }
 0x1cc   : > { %v745_v29 = vpop.f32.mrb[6].mxu0 }
 0x1cd   : > { %v749_v30 = vmul.f32 0.125, %v745_v29  ;;  %v2447_v31 = vpop.f32.mrb[7].mxu0 }
 0x1cf   : > { %v751_v32 = vsel %vm750_vm3, %v749_v30, -inf }
 0x1d0   : > { %752 = vmax.xlane.f32.xlu0 %v751_v32 }
 0x240   : > { %v910_v33 = vpop.f32.mrb[8].mxu0 }
 0x241   : > { %v914_v34 = vmul.f32 0.125, %v910_v33  ;;  %v2457_v35 = vpop.f32.mrb[9].mxu0 }
 0x243   : > { %v915_v36 = vsel %vm750_vm3, %v914_v34, -inf }
 0x244   : > { %916 = vmax.xlane.f32.xlu1 %v915_v36  ;;  %v1081_v37 = vpop.f32.mrb[10].mxu0 }
 0x245   : > { %v1085_v38 = vmul.f32 0.125, %v1081_v37  ;;  %v2467_v39 = vpop.f32.mrb[11].mxu0 }
 0x247   : > { %v1086_v40 = vsel %vm750_vm3, %v1085_v38, -inf }
 0x248   : > { %1087 = vmax.xlane.f32.xlu0 %v1086_v40  ;;  %v1245_v41 = vpop.f32.mrb[12].mxu0 }
 0x249   : > { %v1249_v42 = vmul.f32 0.125, %v1245_v41  ;;  %v2477_v43 = vpop.f32.mrb[13].mxu0 }
 0x24b   : > { %v1250_v44 = vsel %vm750_vm3, %v1249_v42, -inf }
 0x24c   : > { %1251 = vmax.xlane.f32.xlu0 %v1250_v44  ;;  %v1415_v45 = vpop.f32.mrb[14].mxu0 }
 0x24d   : > { %v1419_v46 = vmul.f32 0.125, %v1415_v45  ;;  %v2487_v47 = vpop.f32.mrb[15].mxu0 }
 0x24f   : > { %v1420_v48 = vsel %vm750_vm3, %v1419_v46, -inf }
 0x250   : > { %1421 = vmax.xlane.f32.xlu1 %v1420_v48  ;;  %v1579_v49 = vpop.f32.mrb[16].mxu0 }
 0x251   : > { %v1583_v50 = vmul.f32 0.125, %v1579_v49  ;;  %v2497_v51 = vpop.f32.mrb[17].mxu0 }
 0x253   : > { %v1584_v52 = vsel %vm750_vm3, %v1583_v50, -inf }
 0x254   : > { %1585 = vmax.xlane.f32.xlu0 %v1584_v52  ;;  %v1749_v53 = vpop.f32.mrb[18].mxu0 }
 0x255   : > { %v1753_v54 = vmul.f32 0.125, %v1749_v53  ;;  %v2507_v55 = vpop.f32.mrb[19].mxu0 }
 0x257   : > { %v1754_v56 = vsel %vm750_vm3, %v1753_v54, -inf }
 0x258   : > { %1755 = vmax.xlane.f32.xlu1 %v1754_v56  ;;  %v1913_v57 = vpop.f32.mrb[20].mxu0 }
 0x259   : > { %v1917_v58 = vmul.f32 0.125, %v1913_v57  ;;  %v2517_v59 = vpop.f32.mrb[21].mxu0 }
 0x25b   : > { %v1918_v60 = vsel %vm750_vm3, %v1917_v58, -inf }
 0x25c   : > { %1919 = vmax.xlane.f32.xlu0 %v1918_v60 }
 0x25d   : > { %v753_v61 = vpop.xlane.xlu0 %752 }
 0x25e   : > { %v754_v62 = vsub.f32 %v749_v30, %v753_v61 }
 0x260   : > { %v755_v63 = vmul.f32 1.442695, %v754_v62 }
 0x262   : > { %2677 = vpow2.f32 %v755_v63 }
 0x269   : > { %927 = vrot.lane.b32.xlu1 %v3012_v6, %s2775_s27 }
 0x26c   : > { %v2678_v0 = vpop.eup %2677 }
 0x26d   : > { %v757_v1 = vsel %vm750_vm3, %v2678_v0, 0.0 }
 0x28d   : > { %758 = vadd.xlane.f32.xlu1 %v757_v1 }
 0x2d1   : > { %v917_v4 = vpop.xlane.xlu1 %916 }
 0x2d2   : > { %v918_v5 = vsub.f32 %v914_v34, %v917_v4 }
 0x2d4   : > { %v919_v9 = vmul.f32 1.442695, %v918_v5  ;;  %v2032_v5 = vld [vmem:[%s3400_s2 + $0x88] sm:$0xff] }
 0x2d5   : > { %v1088_v10 = vpop.xlane.xlu0 %1087 }
 0x2d6   : > { %2679 = vpow2.f32 %v919_v9  ;;  %v1089_v11 = vsub.f32 %v1085_v38, %v1088_v10  ;;  %v2015_v9 = vld [vmem:[%s3400_s2] sm:$0xff] }
 0x2d8   : > { %v1090_v12 = vmul.f32 1.442695, %v1089_v11  ;;  %v2033_v11 = vld [vmem:[%s3400_s2 + $0x90] sm:$0xff] }
 0x2d9   : > { %v1252_v6 = vpop.xlane.xlu0 %1251 }
 0x2da   : > { %2681 = vpow2.f32 %v1090_v12  ;;  %v1253_v13 = vsub.f32 %v1249_v42, %v1252_v6  ;;  %v2034_v12 = vld [vmem:[%s3400_s2 + $0x98] sm:$0xff] }
 0x2dc   : > { %v1254_v14 = vmul.f32 1.442695, %v1253_v13  ;;  %v2575_v13 = vpack.c.bf16 %v2034_v12, %v2033_v11  ;;  %v2070_v11 = vld [vmem:[%s3400_s2 + $0x1b8] sm:$0xff] }
 0x2dd   : > { %v1422_v15 = vpop.xlane.xlu1 %1421 }
 0x2de   : > { %2683 = vpow2.f32 %v1254_v14  ;;  %v1423_v16 = vsub.f32 %v1419_v46, %v1422_v15  ;;  %v2017_v14 = vld [vmem:[%s3400_s2 + $0x10] sm:$0xff]  ;;  %v2018_v15 = vld [vmem:[%s3400_s2 + $0x18] sm:$0xff] }
 0x2e0   : > { %v2680_v17 = vpop.eup %2679  ;;  %v1424_v18 = vmul.f32 1.442695, %v1423_v16  ;;  %v2577_v16 = vpack.c.bf16 %v2018_v15, %v2017_v14  ;;  %v2030_v14 = vld [vmem:[%s3400_s2 + $0x78] sm:$0xff]  ;;  %v2053_v15 = vld [vmem:[%s3400_s2 + $0x130] sm:$0xff] }
 0x2e1   : > { %v1586_v19 = vpop.xlane.xlu0 %1585  ;;  %v921_v20 = vsel %vm750_vm3, %v2680_v17, 0.0 }
 0x2e2   : > { %2685 = vpow2.f32 %v1424_v18  ;;  %v1587_v21 = vsub.f32 %v1583_v50, %v1586_v19  ;;  %922 = vadd.xlane.f32.xlu0 %v921_v20  ;;  %v2035_v19 = vld [vmem:[%s3400_s2 + $0xa0] sm:$0xff]  ;;  %v2036_v20 = vld [vmem:[%s3400_s2 + $0xa8] sm:$0xff] }
 0x2e4   : > { %v2682_v23 = vpop.eup %2681  ;;  %v1588_v24 = vmul.f32 1.442695, %v1587_v21  ;;  %v2579_v21 = vpack.c.bf16 %v2036_v20, %v2035_v19  ;;  %v2071_v19 = vld [vmem:[%s3400_s2 + $0x1c0] sm:$0xff]  ;;  %v2072_v20 = vld [vmem:[%s3400_s2 + $0x1c8] sm:$0xff] }
 0x2e5   : > { %v1756_v22 = vpop.xlane.xlu1 %1755  ;;  %v1092_v25 = vsel %vm750_vm3, %v2682_v23, 0.0 }
 0x2e6   : > { %2687 = vpow2.f32 %v1588_v24  ;;  %v1757_v26 = vsub.f32 %v1753_v54, %v1756_v22  ;;  %1093 = vadd.xlane.f32.xlu1 %v1092_v25  ;;  %v2020_v24 = vld [vmem:[%s3400_s2 + $0x28] sm:$0xff]  ;;  %v2037_v22 = vld [vmem:[%s3400_s2 + $0xb0] sm:$0xff] }
 0x2e8   : > { %v2684_v27 = vpop.eup %2683  ;;  %v1758_v28 = vmul.f32 1.442695, %v1757_v26  ;;  %v2038_v26 = vld [vmem:[%s3400_s2 + $0xb8] sm:$0xff] }
 0x2e9   : > { %v1920_v29 = vpop.xlane.xlu0 %1919  ;;  %v1256_v30 = vsel %vm750_vm3, %v2684_v27, 0.0  ;;  %v928_v41 = vpop.permute.xlu1 %927 }
 0x2ea   : > { %2689 = vpow2.f32 %v1758_v28  ;;  %v1921_v31 = vsub.f32 %v1917_v58, %v1920_v29  ;;  %1257 = vadd.xlane.f32.xlu0 %v1256_v30  ;;  %v2022_v28 = vld [vmem:[%s3400_s2 + $0x38] sm:$0xff]  ;;  %v2583_v29 = vpack.c.bf16 %v2038_v26, %v2037_v22  ;;  %v2039_v30 = vld [vmem:[%s3400_s2 + $0xc0] sm:$0xff] }
 0x2eb   : > { %v2074_v26 = vld [vmem:[%s3400_s2 + $0x1d8] sm:$0xff] }
 0x2ec   : > { %v2686_v32 = vpop.eup %2685  ;;  %v1922_v33 = vmul.f32 1.442695, %v1921_v31  ;;  %v2040_v31 = vld [vmem:[%s3400_s2 + $0xc8] sm:$0xff] }
 0x2ed   : > { %v1426_v34 = vsel %vm750_vm3, %v2686_v32, 0.0 }
 0x2ee   : > { %2691 = vpow2.f32 %v1922_v33  ;;  %1427 = vadd.xlane.f32.xlu1 %v1426_v34  ;;  %v2064_v34 = vld [vmem:[%s3400_s2 + $0x188] sm:$0xff] }
 0x2f0   : > { %v2688_v35 = vpop.eup %2687 }
 0x2f1   : > { %v1590_v36 = vsel %vm750_vm3, %v2688_v35, 0.0 }
 0x2f2   : > { %1591 = vadd.xlane.f32.xlu0 %v1590_v36  ;;  %v2024_v36 = vld [vmem:[%s3400_s2 + $0x48] sm:$0xff] }
 0x2f4   : > { %v3100_v37 = vpop.eup %2689 }
 0x2f5   : > { %v1760_v38 = vsel %vm750_vm3, %v3100_v37, 0.0 }
 0x2f6   : > { %1761 = vadd.xlane.f32.xlu1 %v1760_v38 }
 0x2f8   : > { %v3104_v39 = vpop.eup %2691 }
 0x2f9   : > { %v1924_v40 = vsel %vm750_vm3, %v3104_v39, 0.0 }
 0x2fa   : > { %1925 = vadd.xlane.f32.xlu0 %v1924_v40  ;;  %v2048_v40 = vld [vmem:[%s3400_s2 + $0x108] sm:$0xff] }
 0x307   : > { %1596 = vrot.lane.b32.xlu1 %v3091_v2, %s2775_s27 }
 0x30b   : > { %1930 = vrot.lane.b32.xlu1 %v3093_v3, %s2775_s27 }
 0x310   : > { %1262 = vrot.lane.b32.xlu0 %v3014_v8, %s2775_s27 }
 0x31a   : > { %v759_v42 = vpop.xlane.xlu1 %758 }
 0x31b   : > { %2693 = vrcp.f32 %v759_v42 }
 0x325   : > { %v2694_v43 = vpop.eup %2693 }
 0x326   : > { %v761_v44 = vmul.f32 %v2694_v43, %v2678_v0  ;;  %v2042_v43 = vld [vmem:[%s3400_s2 + $0xd8] sm:$0xff] }
 0x328   : > { %2451 = vmatmul.mubr.msk.f32.vlgmr.msra.gmra.mrb[6].mxu1 %vm750_vm3, %v761_v44  ;;  %v2065_v44 = vld [vmem:[%s3400_s2 + $0x190] sm:$0xff] }
 0x329   : > { %2459 = vmatpush3.msra.mxu1 %v928_v41  ;;  %2460 = vmatprep.mubr.msk.f32.mxu1 %vm2774_vm1, %v2773_v7  ;;  %v2041_v41 = vld [vmem:[%s3400_s2 + $0xd0] sm:$0xff] }
 0x32a   : > { %2468 = vmatprep.subr.mxu1 %v2773_v7 }
 0x36f   : > { %v923_v45 = vpop.xlane.xlu0 %922 }
 0x370   : > { %2695 = vrcp.f32 %v923_v45  ;;  %v2066_v45 = vld [vmem:[%s3400_s2 + $0x198] sm:$0xff] }
 0x373   : > { %v1094_v46 = vpop.xlane.xlu1 %1093 }
 0x374   : > { %2697 = vrcp.f32 %v1094_v46  ;;  %v2607_v46 = vpack.c.bf16 %v2066_v45, %v2065_v44  ;;  %v2062_v44 = vld [vmem:[%s3400_s2 + $0x178] sm:$0xff] }
 0x377   : > { %v1258_v49 = vpop.xlane.xlu0 %1257 }
 0x378   : > { %2699 = vrcp.f32 %v1258_v49  ;;  %v2050_v49 = vld [vmem:[%s3400_s2 + $0x118] sm:$0xff] }
 0x37a   : > { %v2696_v47 = vpop.eup %2695 }
 0x37b   : > { %v925_v48 = vmul.f32 %v2696_v47, %v2680_v17  ;;  %v1428_v52 = vpop.xlane.xlu1 %1427  ;;  %v2049_v47 = vld [vmem:[%s3400_s2 + $0x110] sm:$0xff] }
 0x37c   : > { %2701 = vrcp.f32 %v1428_v52  ;;  %v2026_v52 = vld [vmem:[%s3400_s2 + $0x58] sm:$0xff] }
 0x37d   : > { %2461 = vmatmul.mubr.msk.f32.vlgmr.msra.gmra.mrb[8].mxu1 %vm750_vm3, %v925_v48 }
 0x37e   : > { %v2698_v50 = vpop.eup %2697  ;;  %2469 = vmatpush3.msra.mxu1 %v3014_v8  ;;  %2470 = vmatprep.mubr.msk.f32.mxu1 %vm2774_vm1, %v2773_v7 }
 0x37f   : > { %v1096_v51 = vmul.f32 %v2698_v50, %v2682_v23  ;;  %2478 = vmatprep.subr.mxu1 %v2773_v7  ;;  %v1592_v53 = vpop.xlane.xlu0 %1591  ;;  %v2019_v23 = vld [vmem:[%s3400_s2 + $0x20] sm:$0xff]  ;;  %v2591_v50 = vpack.c.bf16 %v2042_v43, %v2041_v41  ;;  %v2061_v43 = vld [vmem:[%s3400_s2 + $0x170] sm:$0xff] }
 0x380   : > { %2703 = vrcp.f32 %v1592_v53  ;;  %v2581_v25 = vpack.c.bf16 %v2020_v24, %v2019_v23  ;;  %v2609_v53 = vpack.c.bf16 %v2050_v49, %v2049_v47  ;;  %v2055_v23 = vld [vmem:[%s3400_s2 + $0x140] sm:$0xff]  ;;  %v2056_v24 = vld [vmem:[%s3400_s2 + $0x148] sm:$0xff]  ;;  %v2633_v47 = vpack.c.bf16 %v2062_v44, %v2061_v43 }
 0x381   : > { %2471 = vmatmul.mubr.msk.f32.vlgmr.msra.gmra.mrb[10].mxu1 %vm750_vm3, %v1096_v51  ;;  %v2025_v51 = vld [vmem:[%s3400_s2 + $0x50] sm:$0xff]  ;;  %v2621_v22 = vpack.c.bf16 %v2056_v24, %v2055_v23 }
 0x382   : > { %2480 = vmatprep.mubr.msk.f32.mxu1 %vm2774_vm1, %v2773_v7  ;;  %v2700_v56 = vpop.eup %2699 }
 0x383   : > { %v1762_v54 = vpop.xlane.xlu1 %1761  ;;  %v1260_v8 = vmul.f32 %v2700_v56, %v2684_v27  ;;  %v2021_v27 = vld [vmem:[%s3400_s2 + $0x30] sm:$0xff] }
 0x384   : > { %2705 = vrcp.f32 %v1762_v54  ;;  %v2585_v33 = vpack.c.bf16 %v2022_v28, %v2021_v27  ;;  %v2593_v54 = vpack.c.bf16 %v2026_v52, %v2025_v51  ;;  %v2057_v27 = vld [vmem:[%s3400_s2 + $0x150] sm:$0xff] }
 0x386   : > { %v2702_v58 = vpop.eup %2701 }
 0x387   : > { %v1926_v55 = vpop.xlane.xlu0 %1925  ;;  %v1430_v59 = vmul.f32 %v2702_v58, %v2686_v32  ;;  %v1597_v61 = vpop.permute.xlu1 %1596  ;;  %v2063_v32 = vld [vmem:[%s3400_s2 + $0x180] sm:$0xff] }
 0x388   : > { %2707 = vrcp.f32 %v1926_v55  ;;  %v2603_v38 = vpack.c.bf16 %v2064_v34, %v2063_v32  ;;  %v2067_v58 = vld [vmem:[%s3400_s2 + $0x1a0] sm:$0xff]  ;;  %v2076_v34 = vld [vmem:[%s3400_s2 + $0x1e8] sm:$0xff] }
 0x38a   : > { %v2704_v60 = vpop.eup %2703 }
 0x38b   : > { %v1263_v57 = vpop.permute.xlu0 %1262  ;;  %v1594_v62 = vmul.f32 %v2704_v60, %v2688_v35  ;;  %v2023_v35 = vld [vmem:[%s3400_s2 + $0x40] sm:$0xff] }
 0x38c   : > { %2479 = vmatpush3.msra.mxu1 %v1263_v57  ;;  %v2589_v48 = vpack.c.bf16 %v2024_v36, %v2023_v35  ;;  %v2044_v57 = vld [vmem:[%s3400_s2 + $0xe8] sm:$0xff] }
 0x38d   : > { %2481 = vmatmul.mubr.msk.f32.vlgmr.msra.gmra.mrb[12].mxu1 %vm750_vm3, %v1260_v8  ;;  %2488 = vmatprep.subr.mxu1 %v2773_v7  ;;  %v2043_v8 = vld [vmem:[%s3400_s2 + $0xe0] sm:$0xff] }
 0x38e   : > { %2489 = vmatpush3.msra.mxu1 %v3091_v2  ;;  %2490 = vmatprep.mubr.msk.f32.mxu1 %vm2774_vm1, %v2773_v7  ;;  %v2706_v63 = vpop.eup %2705  ;;  %v1931_v2 = vpop.permute.xlu1 %1930  ;;  %v2595_v60 = vpack.c.bf16 %v2044_v57, %v2043_v8 }
 0x38f   : > { %2498 = vmatprep.subr.mxu1 %v2773_v7  ;;  %v1764_v0 = vmul.f32 %v2706_v63, %v3100_v37  ;;  %v2587_v37 = vpack.c.bf16 %v2040_v31, %v2039_v30  ;;  %v2028_v63 = vld [vmem:[%s3400_s2 + $0x68] sm:$0xff] }
 0x391   : > { %2491 = vmatmul.mubr.msk.f32.vlgmr.msra.gmra.mrb[14].mxu1 %vm750_vm3, %v1430_v59 }
 0x392   : > { %2499 = vmatpush3.msra.mxu1 %v1597_v61  ;;  %2500 = vmatprep.mubr.msk.f32.mxu1 %vm2774_vm1, %v2773_v7  ;;  %v2708_v1 = vpop.eup %2707  ;;  %v2068_v61 = vld [vmem:[%s3400_s2 + $0x1a8] sm:$0xff] }
 0x393   : > { %2508 = vmatprep.subr.mxu1 %v2773_v7  ;;  %v1928_v4 = vmul.f32 %v2708_v1, %v3104_v39  ;;  %v2047_v39 = vld [vmem:[%s3400_s2 + $0x100] sm:$0xff]  ;;  %v2611_v1 = vpack.c.bf16 %v2068_v61, %v2067_v58 }
 0x394   : > { %v2605_v42 = vpack.c.bf16 %v2048_v40, %v2047_v39  ;;  %v2077_v39 = vld [vmem:[%s3400_s2 + $0x1f0] sm:$0xff] }
 0x395   : > { %2501 = vmatmul.mubr.msk.f32.vlgmr.msra.gmra.mrb[16].mxu1 %vm750_vm3, %v1594_v62  ;;  %v2027_v62 = vld [vmem:[%s3400_s2 + $0x60] sm:$0xff] }
 0x396   : > { %2509 = vmatpush3.msra.mxu1 %v3093_v3  ;;  %2510 = vmatprep.mubr.msk.f32.mxu1 %vm2774_vm1, %v2773_v7  ;;  %v2031_v3 = vld [vmem:[%s3400_s2 + $0x80] sm:$0xff] }
 0x397   : > { %2518 = vmatprep.subr.mxu1 %v2773_v7  ;;  %v2571_v10 = vpack.c.bf16 %v2032_v5, %v2031_v3  ;;  %v2052_v3 = vld [vmem:[%s3400_s2 + $0x128] sm:$0xff]  ;;  %v2045_v5 = vld [vmem:[%s3400_s2 + $0xf0] sm:$0xff] }
 0x399   : > { %2511 = vmatmul.mubr.msk.f32.vlgmr.msra.gmra.mrb[18].mxu1 %vm750_vm3, %v1764_v0  ;;  %2572 = vmatprep.subr.bf16.mxu0 %v2571_v10  ;;  %v2046_v10 = vld [vmem:[%s3400_s2 + $0xf8] sm:$0xff] }
 0x39a   : > { %2519 = vmatpush3.msra.mxu1 %v1931_v2  ;;  %2520 = vmatprep.mubr.msk.f32.mxu1 %vm2774_vm1, %v2773_v7  ;;  %v2016_v7 = vld [vmem:[%s3400_s2 + $0x8] sm:$0xff]  ;;  %v2597_v2 = vpack.c.bf16 %v2028_v63, %v2027_v62  ;;  %v2599_v12 = vpack.c.bf16 %v2046_v10, %v2045_v5  ;;  %v2336_v63 = vld [vmem:[%s3401_s3] ss:$0 sm:$0xff] }
 0x39b   : > { %v2573_v6 = vpack.c.bf16 %v2016_v7, %v2015_v9  ;;  %2604 = vmatprep.subr.bf16.mxu1 %v2603_v38  ;;  %v2069_v7 = vld [vmem:[%s3400_s2 + $0x1b0] sm:$0xff]  ;;  %v2060_v38 = vld [vmem:[%s3400_s2 + $0x168] sm:$0xff] }
 0x39d   : > { %2521 = vmatmul.mubr.msk.f32.vlgmr.msra.gmra.mrb[20].mxu1 %vm750_vm3, %v1928_v4  ;;  %2574 = vmatpush3.bf16.msra.mxu0 %v2573_v6  ;;  %v2051_v4 = vld [vmem:[%s3400_s2 + $0x120] sm:$0xff]  ;;  %v2615_v6 = vpack.c.bf16 %v2070_v11, %v2069_v7 }
 0x39e   : > { %2576 = vmatprep.subr.bf16.mxu0 %v2575_v13  ;;  %2606 = vmatpush3.bf16.msra.mxu1 %v2605_v42  ;;  %v2613_v9 = vpack.c.bf16 %v2052_v3, %v2051_v4  ;;  %v2029_v13 = vld [vmem:[%s3400_s2 + $0x70] sm:$0xff]  ;;  %v2078_v42 = vld [vmem:[%s3400_s2 + $0x1f8] sm:$0xff] }
 0x39f   : > { %2608 = vmatprep.subr.bf16.mxu1 %v2607_v46  ;;  %v2631_v45 = vpack.c.bf16 %v2078_v42, %v2077_v39 }
 0x3a1   : > { %2578 = vmatpush3.bf16.msra.mxu0 %v2577_v16  ;;  %v2601_v16 = vpack.c.bf16 %v2030_v14, %v2029_v13 }
 0x3a2   : > { %2580 = vmatprep.subr.bf16.mxu0 %v2579_v21  ;;  %2610 = vmatpush3.bf16.msra.mxu1 %v2609_v53  ;;  %v2619_v21 = vpack.c.bf16 %v2072_v20, %v2071_v19 }
 0x3a3   : > { %2612 = vmatprep.subr.bf16.mxu1 %v2611_v1 }
 0x3a5   : > { %2582 = vmatpush3.bf16.msra.mxu0 %v2581_v25  ;;  %v2073_v25 = vld [vmem:[%s3400_s2 + $0x1d0] sm:$0xff] }
 0x3a6   : > { %2584 = vmatprep.subr.bf16.mxu0 %v2583_v29  ;;  %2614 = vmatpush3.bf16.msra.mxu1 %v2613_v9  ;;  %v2623_v28 = vpack.c.bf16 %v2074_v26, %v2073_v25  ;;  %v2058_v29 = vld [vmem:[%s3400_s2 + $0x158] sm:$0xff] }
 0x3a7   : > { %2616 = vmatprep.subr.bf16.mxu1 %v2615_v6  ;;  %v2625_v31 = vpack.c.bf16 %v2058_v29, %v2057_v27 }
 0x3a9   : > { %2586 = vmatpush3.bf16.msra.mxu0 %v2585_v33  ;;  %v2075_v33 = vld [vmem:[%s3400_s2 + $0x1e0] sm:$0xff] }
 0x3aa   : > { %2588 = vmatprep.subr.bf16.mxu0 %v2587_v37  ;;  %v2627_v36 = vpack.c.bf16 %v2076_v34, %v2075_v33  ;;  %v2059_v37 = vld [vmem:[%s3400_s2 + $0x160] sm:$0xff] }
 0x3ab   : > { %v2629_v41 = vpack.c.bf16 %v2060_v38, %v2059_v37 }
 0x3ad   : > { %2590 = vmatpush3.bf16.msra.mxu0 %v2589_v48 }
 0x3ae   : > { %2592 = vmatprep.subr.bf16.mxu0 %v2591_v50 }
 0x3b1   : > { %2594 = vmatpush3.bf16.msra.mxu0 %v2593_v54 }
 0x3b2   : > { %2596 = vmatprep.subr.bf16.mxu0 %v2595_v60 }
 0x3b5   : > { %2598 = vmatpush3.bf16.msra.mxu0 %v2597_v2 }
 0x3b6   : > { %2600 = vmatprep.subr.bf16.mxu0 %v2599_v12 }
 0x3b9   : > { %2602 = vmatpush3.bf16.msra.mxu0 %v2601_v16 }
 0x3fb   : > { %v831_v17 = vpop.f32.mrb[6].mxu1 }
 0x3fc   : > { %835 = vst.msk [vmem:[#allocation2] sm:$0xff] %vm672_vm2, %v831_v17  ;;  %v2452_v18 = vpop.f32.mrb[7].mxu1  ;;  %v2054_v17 = vld [vmem:[%s3400_s2 + $0x138] sm:$0xff] }
 0x3fd   : > { %v2617_v18 = vpack.c.bf16 %v2054_v17, %v2053_v15 }
 0x3ff   : > { %2618 = vmatpush3.bf16.msra.mxu1 %v2617_v18 }
 0x400   : > { %2620 = vmatprep.subr.bf16.mxu1 %v2619_v21 }
 0x403   : > { %2622 = vmatpush3.bf16.msra.mxu1 %v2621_v22 }
 0x404   : > { %2624 = vmatprep.subr.bf16.mxu1 %v2623_v28 }
 0x407   : > { %2626 = vmatpush3.bf16.msra.mxu1 %v2625_v31 }
 0x408   : > { %2628 = vmatprep.subr.bf16.mxu1 %v2627_v36 }
 0x40b   : > { %2630 = vmatpush3.bf16.msra.mxu1 %v2629_v41 }
 0x40c   : > { %2632 = vmatprep.subr.bf16.mxu1 %v2631_v45 }
 0x40f   : > { %2634 = vmatpush3.bf16.msra.mxu1 %v2633_v47 }
 0x450   : > { %v999_v55 = vpop.f32.mrb[8].mxu1 }
 0x451   : > { %1004 = vrot.lane.b32.xlu1 %v999_v55, %s2775_s27  ;;  %v2462_v56 = vpop.f32.mrb[9].mxu1 }
 0x454   : > { %v1166_v59 = vpop.f32.mrb[10].mxu1 }
 0x455   : > { %1170 = vst.msk [vmem:[#allocation2 + $0x8] sm:$0xff] %vm672_vm2, %v1166_v59  ;;  %v2472_v0 = vpop.f32.mrb[11].mxu1 }
 0x460   : > { %v1334_v30 = vpop.f32.mrb[12].mxu1 }
 0x461   : > { %1339 = vrot.lane.b32.xlu0 %v1334_v30, %s2775_s27  ;;  %v2482_v32 = vpop.f32.mrb[13].mxu1 }
 0x464   : > { %v1500_v35 = vpop.f32.mrb[14].mxu1 }
 0x465   : > { %1504 = vst.msk [vmem:[#allocation2 + $0x10] sm:$0xff] %vm672_vm2, %v1500_v35  ;;  %v2492_v40 = vpop.f32.mrb[15].mxu1 }
 0x468   : > { %v1668_v46 = vpop.f32.mrb[16].mxu1 }
 0x469   : > { %1673 = vrot.lane.b32.xlu1 %v1668_v46, %s2775_s27  ;;  %v2502_v48 = vpop.f32.mrb[17].mxu1 }
 0x46c   : > { %v1834_v49 = vpop.f32.mrb[18].mxu1 }
 0x46d   : > { %1838 = vst.msk [vmem:[#allocation2 + $0x18] sm:$0xff] %vm672_vm2, %v1834_v49  ;;  %v2512_v50 = vpop.f32.mrb[19].mxu1 }
 0x470   : > { %v2002_v51 = vpop.f32.mrb[20].mxu1 }
 0x471   : > { %2007 = vrot.lane.b32.xlu0 %v2002_v51, %s2775_s27  ;;  %v2522_v52 = vpop.f32.mrb[21].mxu1  ;;  %s186_s27 = sand.u32 1, %s2763_s16  }
 0x472   : > { %s2304_s28 = sshll.u32 %s186_s27, 3  ;;  %s2228_s11 = scalar_lea.sflag [#allocation4], %s186_s27 }
 0x473   : > { %s188_s5 = scalar_lea.vmem [#allocation3], %s2304_s28 }
 0x474   : > { %s2241_s7 = sshll.u32 %s188_s5, 4  ;;  %s3357_s7 = int_to_ptr.vmem [resolvable:$true] %s2241_s7 }
 0x475   : > { %s2709_s12 = scalar_lea.vmem %s3357_s7, 128  ;;  %p2716_p0 = scmp.lt.s32.totalorder %s3357_s7, %s2714_s13 }
 0x476   : > { %p2710_p11 = scmp.ne.s32.totalorder %s3357_s7, %s2709_s12  ;;  %p2717_p1 = scmp.lt.s32.totalorder %s2715_s14, %s2709_s12 }
 0x478   : > { %p2711_p12 = pnand %p2710_p11, %p2840_p5  ;;  %p2718_p2 = por %p2717_p1, %p2716_p0 }
 0x47a   : > { %p2712_p13 = pneg %p2711_p12 }
 0x47c   : > { %p2719_p3 = pnand %p2718_p2, %p2712_p13 }
 0x4c3   : > { %v1005_v53 = vpop.permute.xlu1 %1004 }
 0x4c4   : > { %1008 = vst.msk [vmem:[#allocation2] sm:$0xff] %vm1007_vm4, %v1005_v53 }
 0x4cb   : > { %v2011_v8 = vld [vmem:[#allocation2] sm:$0xff] }
 0x4d3   : > { %v1340_v54 = vpop.permute.xlu0 %1339 }
 0x4d4   : > { %1342 = vst.msk [vmem:[#allocation2 + $0x8] sm:$0xff] %vm1007_vm4, %v1340_v54 }
 0x4db   : > { %v1674_v55 = vpop.permute.xlu1 %1673  ;;  %v2012_v56 = vld [vmem:[#allocation2 + $0x8] sm:$0xff] }
 0x4dc   : > { %1676 = vst.msk [vmem:[#allocation2 + $0x10] sm:$0xff] %vm1007_vm4, %v1674_v55  ;;  %2150 = vmatprep.mubr.f32.mxu0 %v2012_v56 }
 0x4dd   : > { %2151 = vmatmul.mubr.f32.vlgmr.msra.gmra.mrb[22].mxu0 %v2011_v8 }
 0x4e3   : > { %v2008_v57 = vpop.permute.xlu0 %2007  ;;  %v2013_v59 = vld [vmem:[#allocation2 + $0x10] sm:$0xff] }
 0x4e4   : > { %2010 = vst.msk [vmem:[#allocation2 + $0x18] sm:$0xff] %vm1007_vm4, %v2008_v57 }
 0x4eb   : > { %v2014_v58 = vld [vmem:[#allocation2 + $0x18] sm:$0xff] }
 0x4ec   : > { %2220 = vmatprep.mubr.f32.mxu1 %v2014_v58 }
 0x4ed   : > { %2221 = vmatmul.mubr.f32.vlgmr.msra.gmra.mrb[22].mxu1 %v2013_v59 }
 0x5b0   : > { %v2405_v60 = vpop.f32.mrb[22].mxu0 }
 0x5b1   : > { %v2406_v61 = vpop.f32.mrb[23].mxu0 }
 0x5b2   : > { %v2407_v62 = vadd.f32 %v2406_v61, %v2405_v60 }
 0x5b4   : > { %v2153_v2 = vadd.f32 %v2407_v62, %v2336_v63 }
 0x5c0   : > { %v2440_v0 = vpop.f32.mrb[22].mxu1 }
 0x5c1   : > { %v2441_v1 = vpop.f32.mrb[23].mxu1 }
 0x5c2   : > { %v2442_v4 = vadd.f32 %v2441_v1, %v2440_v0 }
 0x5c4   : > { %v2223_v3 = vadd.f32 %v2442_v4, %v2153_v2 }
 0x5c6   : > { %2226 = vst.msk [vmem:[%s188_s5] sm:$0xff] %vm242_vm0, %v2223_v3 }
 0x5c7   : > { %2722 = shalt.err (!%p2719_p3)
}
 0x5c8   : > { %s2723_s20 = scalar_lea.hbm %s3355_s10, 128  ;;  %s2727_s27 = scalar_lea.hbm %s3402_s4, 256 }
 0x5c9   : > { %p2724_p4 = scmp.ne.s32.totalorder %s3355_s10, %s2723_s20  ;;  %p2728_p9 = scmp.lt.u32.totalorder %s3355_s10, %s3402_s4 }
 0x5ca   : > { %p2729_p10 = scmp.lt.u32.totalorder %s2727_s27, %s2723_s20  ;;  %p2731_p12 = scmp.lt.u32.totalorder %s2723_s20, %s3355_s10 }
 0x5cb   : > { %p2725_p7 = pnand %p2724_p4, %p2840_p5 }
 0x5cc   : > { %p2730_p11 = por %p2729_p10, %p2728_p9 }
 0x5cd   : > { %p2726_p8 = pneg %p2725_p7 }
 0x5ce   : > { %p2732_p13 = por %p2731_p12, %p2730_p11 }
 0x5d0   : > { %p2733_p0 = pnand %p2732_p13, %p2726_p8 }
 0x5d2   : > { %2736 = shalt.err (!%p2733_p0)
}
 0x5d3   : > { %2635 = dma.vmem_to_hbm [thread:$0]  (%p2840_p5), %s3357_s7, 128, %s3355_s10, %s2228_s11  }
 0x5d4 PF: > { %p2641_p1 = scmp.ge.s32.totalorder %s2771_s18, 2  ;;  %s2253_s30 = sand.u32 1, %s2759_s15  }
 0x5d5   : > { %s2254_s6 = scalar_lea.sflag [#allocation4], %s2253_s30 }
 0x5d6   : > { %p2638_p2 = pnand %p2641_p1, %p2844_p6 }
 0x5d8   : > { %2754 = dma.done.wait (!%p2638_p2), %s2254_s6, 128  }
 0x5d9   : > { %2756 = vsyncadd (!%p2638_p2), %s2254_s6, 4294967168  ;;  %p14_p3 = scmp.ge.s32.totalorder %s2827_s21, 4   ;;  %s3405_s15 = smov %s2763_s16 }
 0x5da   : > { %s3406_s16 = smov %s2767_s17  ;;  %s3407_s17 = smov %s2838_s24 }
 0x5db   : > { %s3408_s18 = smov %s2827_s21  ;;  %16 = sbr.rel (!%p14_p3) target bundleno = 3 (0x3), region = 71 }
 0x5e2   :  { %2259 = vsyncpa [#allocation4], 1 }
 0x5e3   :  { %2261 = vsyncpa [#allocation4 + $0x1], 1 }

</bundles_post_ra>
